<compile_context>
chip_gen: v7x
topology: tpu7x:2x2x1
jax: 0.10.0
libtpu: 0.0.40
codegen_flags: <defaults>
</compile_context>

<pallas_src>
import jax
import jax.numpy as jnp
from jax import lax
from jax.experimental import pallas as pl
from jax.experimental.pallas import tpu as pltpu


# ----------------------------- kernel --------------------------------------


def _up_conv_kernel(xm_ref, xh_ref, w_ref, b_ref, o_ref):
    # xm_ref: (TH,  W+2, Cin)      bf16  rows [t*TH, t*TH+TH) of the padded input
    # xh_ref: (2,   W+2, Cin)      bf16  2-row halo: rows [t*TH+TH, t*TH+TH+2)
    # w_ref : (2, 6*Cin, 2*Cout)   bf16  per row-phase weights (BN scale folded in)
    # b_ref : (1, 2*Cout)          f32   conv bias + BN bias, folded
    # o_ref : (TH, 2, W, 2*Cout)         output rows 2*(t*TH+i)+p, cols (q, c) packed
    TH, _, W, C2 = o_ref.shape
    Cin = xm_ref.shape[-1]
    K6 = 6 * Cin

    # main + halo rows -> (TH+2, W+2, Cin); concat along untiled leading axis
    xt = jnp.concatenate([xm_ref[...], xh_ref[...]], axis=0)

    # im2col over the 3 column taps: lane axis -> (col_shift, cin)
    xcol = jnp.concatenate(
        [xt[:, 0:W], xt[:, 1:W + 1], xt[:, 2:W + 2]], axis=-1)       # (TH+2, W, 3*Cin)

    # fold the two row taps (dy) into the contraction axis once: K = 6*Cin
    xcat = jnp.concatenate([xcol[0:TH + 1], xcol[1:TH + 2]], axis=-1)  # (TH+1, W, 6*Cin)

    bias = b_ref[...]                                                 # (1, 2*Cout) f32
    for p in range(2):                                                # output row phase
        lhs = xcat[p:p + TH].reshape(TH * W, K6)
        acc = jnp.dot(lhs, w_ref[p], preferred_element_type=jnp.float32)
        y = jnp.maximum(acc + bias, 0.0)            # BN scale already folded into w_ref
        o_ref[:, p, :, :] = y.reshape(TH, W, C2).astype(o_ref.dtype)


# -------------------------- tile-size selection -----------------------------


def _round_up(x, m):
    return (x + m - 1) // m * m


def _padded_bytes(shape, itemsize):
    """VMEM footprint: minor dim -> 128 lanes, 2nd-minor -> 8/16/32 sublanes."""
    sub = {4: 8, 2: 16, 1: 32}.get(itemsize, 8)
    if len(shape) == 0:
        return itemsize
    if len(shape) == 1:
        return _round_up(shape[0], 128) * itemsize
    lead = 1
    for d in shape[:-2]:
        lead *= d
    return lead * _round_up(shape[-2], sub) * _round_up(shape[-1], 128) * itemsize


def _vmem_capacity_bytes():
    try:
        cap = getattr(pltpu.get_tpu_info(), "vmem_capacity_bytes", None)
        if cap:
            return int(cap)
    except Exception:
        pass
    return 64 * 1024 * 1024        # conservative default (v7x has the smallest VMEM)


def _vmem_budgets():
    cap = _vmem_capacity_bytes()
    limit = max(32 * 1024 * 1024, min(cap - 16 * 1024 * 1024, 112 * 1024 * 1024))
    budget = (limit * 4) // 5      # headroom for compiler scratch / estimate error
    return budget, limit


def _tile_vmem_bytes(TH, W, Cin, Cout):
    C2, K6 = 2 * Cout, 6 * Cin
    b = 0
    b += 2 * _padded_bytes((TH, W + 2, Cin), 2)      # main input tile, double-buffered
    b += 2 * _padded_bytes((2, W + 2, Cin), 2)       # halo tile, double-buffered
    b += 2 * _padded_bytes((TH * 2, W, C2), 4)       # output tile, double-buffered
    b += 2 * _padded_bytes((2 * K6, C2), 2)          # weights
    # in-kernel temporaries: xt, xcol, xcat, lhs, acc + y
    b += _padded_bytes((TH + 2, W + 2, Cin), 2)
    b += _padded_bytes((TH + 2, W, 3 * Cin), 2)
    b += _padded_bytes((TH + 1, W, K6), 2)
    b += _padded_bytes((TH * W, K6), 2)
    b += 2 * _padded_bytes((TH * W, C2), 4)
    return b


def _pick_row_tile(N, H, W, Cin, Cout, budget):
    """Largest (preferably even) divisor of H whose tiles + temporaries fit."""
    divisors = [t for t in range(min(H, 512), 0, -1) if H % t == 0]
    fitting = [t for t in divisors
               if _tile_vmem_bytes(t, W, Cin, Cout) <= budget] or [1]
    best = fitting[0]
    # even TH keeps the halo a plain blocked view; even grid extent keeps both
    # v7x TensorCores busy.  Never shrink the tile by more than 2x for this.
    even = [t for t in fitting if t % 2 == 0 and 2 * t >= best]
    for t in even:
        if (N * (H // t)) % 2 == 0:
            return t
    if even:
        return even[0]
    return best


# ------------------------------ wrapper -------------------------------------


def up_conv_forward(x_nchw, conv_w, conv_b, bn_gamma, bn_beta, bn_mean, bn_var,
                    eps=1e-5, row_tile=None, nhwc_out=False,
                    out_dtype=jnp.float32):
    """x_nchw: (N, Cin, H, W) float32.  Returns (N, Cout, 2H, 2W) `out_dtype`
    (or NHWC if nhwc_out=True, skipping the final transpose pass)."""
    N, Cin, H, W = x_nchw.shape
    Cout = conv_w.shape[0]
    C2, K6 = 2 * Cout, 6 * Cin

    budget, vmem_limit = _vmem_budgets()
    TH = int(row_tile) if row_tile is not None else _pick_row_tile(
        N, H, W, Cin, Cout, budget)
    assert 1 <= TH <= H and H % TH == 0, (H, TH)
    nT = H // TH

    # --- single layout pass at ORIGINAL resolution (no upsampled intermediate,
    # --- no per-tile halo duplication in HBM) ---
    x_nhwc = jnp.transpose(x_nchw, (0, 2, 3, 1))
    x_pad = jnp.pad(x_nhwc, ((0, 0), (1, 1), (1, 1), (0, 0))).astype(jnp.bfloat16)

    # --- fold (nearest upsample x2 -> 3x3 conv) into 4 sub-pixel phase filters
    # y[2i+p, 2j+q] = sum_{dy,dx in {0,1}} Xpad[i+p+dy, j+q+dx] . Wphase[p,q,dy,dx]
    w_hwio = jnp.transpose(conv_w, (2, 3, 1, 0)).astype(jnp.float32)   # (3,3,Cin,Cout)
    R = jnp.array([[[1., 0., 0.], [0., 1., 1.]],     # phase 0: d0<-k0, d1<-k1+k2
                   [[1., 1., 0.], [0., 0., 1.]]],    # phase 1: d0<-k0+k1, d1<-k2
                  dtype=jnp.float32)                 # R[phase, d, k]
    w_phase = jnp.einsum('pak,qbl,klio->pqabio', R, R, w_hwio)  # (2,2,2,2,Cin,Cout)

    # fold eval-mode BN: scale into the weights, bias into the epilogue add
    scale = bn_gamma / jnp.sqrt(bn_var + eps)                     # (Cout,)
    bias = bn_beta + (conv_b - bn_mean) * scale                   # (Cout,)
    w_phase = w_phase * scale[None, None, None, None, None, :]

    # pack per row-phase p: K axis = (dy, col_shift, cin), N axis = (q, cout)
    wk = jnp.zeros((2, 2, 3, Cin, 2, Cout), jnp.float32)
    for p in range(2):
        for dy in range(2):
            for q in range(2):
                for dx in range(2):
                    wk = wk.at[p, dy, q + dx, :, q, :].set(w_phase[p, q, dy, dx])
    wk = wk.reshape(2, K6, C2).astype(jnp.bfloat16)
    bias2 = jnp.tile(bias, 2).reshape(1, C2).astype(jnp.float32)

    # --- input specs: main TH-row block + 2-row halo block of the SAME array
    main_spec = pl.BlockSpec((None, TH, W + 2, Cin), lambda n, t: (n, t, 0, 0))
    if TH % 2 == 0:
        x_halo = x_pad                        # halo is a plain blocked view
        th2 = TH // 2
        halo_spec = pl.BlockSpec((None, 2, W + 2, Cin),
                                 lambda n, t: (n, (t + 1) * th2, 0, 0))
    else:
        # odd tile height: gather a tiny (2/TH of the input) halo array instead
        hi = (jnp.arange(nT)[:, None] + 1) * TH + jnp.arange(2)[None, :]
        x_halo = x_pad[:, hi]                 # (N, nT, 2, W+2, Cin)
        halo_spec = pl.BlockSpec((None, None, 2, W + 2, Cin),
                                 lambda n, t: (n, t, 0, 0, 0))

    out4 = pl.pallas_call(
        _up_conv_kernel,
        out_shape=jax.ShapeDtypeStruct((N * H, 2, W, C2), out_dtype),
        grid_spec=pltpu.PrefetchScalarGridSpec(
            num_scalar_prefetch=0,
            grid=(N, nT),
            in_specs=[
                main_spec,
                halo_spec,
                pl.BlockSpec((2, K6, C2), lambda n, t: (0, 0, 0)),
                pl.BlockSpec((1, C2), lambda n, t: (0, 0)),
            ],
            out_specs=pl.BlockSpec((TH, 2, W, C2),
                                   lambda n, t: (n * nT + t, 0, 0, 0)),
        ),
        compiler_params=pltpu.CompilerParams(
            dimension_semantics=("parallel", "parallel"),
            vmem_limit_bytes=vmem_limit),
    )(x_pad, x_halo, wk, bias2)

    # (N*H, 2, W, 2*Cout) -> (N, 2H, 2W, Cout): adjacent-dim merges, free reshape
    out_nhwc = out4.reshape(N, 2 * H, 2 * W, Cout)
    if nhwc_out:
        return out_nhwc
    # TODO(synk): nhwc_out=True skips this extra HBM transpose pass over the
    # largest tensor; NCHW kept by default to match PyTorch semantics.
    return jnp.transpose(out_nhwc, (0, 3, 1, 2))


# ------------------------------ reference -----------------------------------


def up_conv_reference(x_nchw, conv_w, conv_b, bn_gamma, bn_beta, bn_mean,
                      bn_var, eps=1e-5):
    """Pure-JAX f32 reference (nearest upsample -> conv -> eval BN -> ReLU)."""
    x_up = jnp.repeat(jnp.repeat(x_nchw, 2, axis=2), 2, axis=3)
    x_nhwc = jnp.transpose(x_up, (0, 2, 3, 1))
    w_hwio = jnp.transpose(conv_w, (2, 3, 1, 0))
    y = lax.conv_general_dilated(
        x_nhwc, w_hwio, window_strides=(1, 1), padding=((1, 1), (1, 1)),
        dimension_numbers=("NHWC", "HWIO", "NHWC"))
    y = y + conv_b[None, None, None, :]
    scale = bn_gamma / jnp.sqrt(bn_var + eps)
    y = (y - bn_mean[None, None, None, :]) * scale[None, None, None, :] \
        + bn_beta[None, None, None, :]
    y = jnp.maximum(y, 0.0)
    return jnp.transpose(y, (0, 3, 1, 2))


# -------------------------------- main --------------------------------------


if __name__ == "__main__":
    key = jax.random.PRNGKey(0)
    k_x, k_w, k_b, k_g, k_be, k_m, k_v = jax.random.split(key, 7)

    N, Cin, H, W = 2, 4, 16, 16
    Cout = 8

    x = jax.random.normal(k_x, (N, Cin, H, W), dtype=jnp.float32)

    # deterministic parameter init (shapes per nn.Conv2d / nn.BatchNorm2d)
    conv_w = jax.random.normal(k_w, (Cout, Cin, 3, 3), dtype=jnp.float32) * 0.1
    conv_b = jax.random.normal(k_b, (Cout,), dtype=jnp.float32) * 0.1
    bn_gamma = 1.0 + 0.1 * jax.random.normal(k_g, (Cout,), dtype=jnp.float32)
    bn_beta = 0.1 * jax.random.normal(k_be, (Cout,), dtype=jnp.float32)
    bn_mean = 0.1 * jax.random.normal(k_m, (Cout,), dtype=jnp.float32)
    bn_var = jnp.abs(1.0 + 0.1 * jax.random.normal(k_v, (Cout,),
                                                   dtype=jnp.float32))

    ref = up_conv_reference(x, conv_w, conv_b, bn_gamma, bn_beta, bn_mean,
                            bn_var)

    # forced row_tile=8 -> grid (2, 2): exercises the multi-tile halo path
    out = up_conv_forward(x, conv_w, conv_b, bn_gamma, bn_beta, bn_mean, bn_var,
                          row_tile=8)
    out = jax.block_until_ready(out)
    assert out.shape == (N, Cout, 2 * H, 2 * W), out.shape
    err = float(jnp.max(jnp.abs(out - ref)))
    # bf16 matmul inputs / BN-scaled bf16 weights vs f32 reference
    assert jnp.allclose(out, ref, atol=3e-2, rtol=3e-2), err

    # auto tile pick -> grid (2, 1): exercises the VMEM-aware picker path
    out2 = up_conv_forward(x, conv_w, conv_b, bn_gamma, bn_beta, bn_mean,
                           bn_var)
    out2 = jax.block_until_ready(out2)
    err2 = float(jnp.max(jnp.abs(out2 - ref)))
    assert jnp.allclose(out2, ref, atol=3e-2, rtol=3e-2), err2

    print("KERNEL_OK")
</pallas_src>

<mosaic_0001>
module attributes {stable_mosaic.version = 11 : i64} {
  func.func @_up_conv_kernel(%arg0: i32, %arg1: i32, %arg2: memref<1x8x18x4xbf16, #tpu.memory_space<vmem>>, %arg3: memref<1x2x18x4xbf16, #tpu.memory_space<vmem>>, %arg4: memref<2x24x16xbf16, #tpu.memory_space<vmem>>, %arg5: memref<1x16xf32, #tpu.memory_space<vmem>>, %arg6: memref<8x2x16x16xf32, #tpu.memory_space<vmem>>) attributes {dimension_semantics = [#tpu.dimension_semantics<parallel>, #tpu.dimension_semantics<parallel>], iteration_bounds = array<i64: 2, 2>, scalar_prefetch = 0 : i64, scratch_operands = 0 : i64, tpu.core_type = #tpu.core_type<tc>, window_params = [{transform_indices = @transform_0, window_bounds = array<i64: 1, 8, 18, 4>}, {transform_indices = @transform_1, window_bounds = array<i64: 1, 2, 18, 4>}, {pipeline_mode = #tpu.pipeline_mode<synchronous>, transform_indices = @transform_2, window_bounds = array<i64: 2, 24, 16>}, {pipeline_mode = #tpu.pipeline_mode<synchronous>, transform_indices = @transform_3, window_bounds = array<i64: 1, 16>}, {transform_indices = @transform_4, window_bounds = array<i64: 8, 2, 16, 16>}]} {
    %c0 = arith.constant 0 : index
    %c0_0 = arith.constant 0 : index
    %c0_1 = arith.constant 0 : index
    %c0_2 = arith.constant 0 : index
    %0 = vector.load %arg2[%c0, %c0_0, %c0_1, %c0_2] : memref<1x8x18x4xbf16, #tpu.memory_space<vmem>>, vector<1x8x18x4xbf16>
    %1 = vector.shape_cast %0 : vector<1x8x18x4xbf16> to vector<8x18x4xbf16>
    %c0_3 = arith.constant 0 : index
    %c0_4 = arith.constant 0 : index
    %c0_5 = arith.constant 0 : index
    %c0_6 = arith.constant 0 : index
    %2 = vector.load %arg3[%c0_3, %c0_4, %c0_5, %c0_6] : memref<1x2x18x4xbf16, #tpu.memory_space<vmem>>, vector<1x2x18x4xbf16>
    %3 = vector.shape_cast %2 : vector<1x2x18x4xbf16> to vector<2x18x4xbf16>
    %4 = tpu.concatenate %1, %3 in 0 : vector<8x18x4xbf16>, vector<2x18x4xbf16> -> vector<10x18x4xbf16>
    %5 = vector.extract_strided_slice %4 {offsets = [0, 0, 0], sizes = [10, 16, 4], strides = [1, 1, 1]} : vector<10x18x4xbf16> to vector<10x16x4xbf16>
    %6 = vector.extract_strided_slice %4 {offsets = [0, 1, 0], sizes = [10, 16, 4], strides = [1, 1, 1]} : vector<10x18x4xbf16> to vector<10x16x4xbf16>
    %7 = vector.extract_strided_slice %4 {offsets = [0, 2, 0], sizes = [10, 16, 4], strides = [1, 1, 1]} : vector<10x18x4xbf16> to vector<10x16x4xbf16>
    %8 = tpu.concatenate %5, %6, %7 in 2 : vector<10x16x4xbf16>, vector<10x16x4xbf16>, vector<10x16x4xbf16> -> vector<10x16x12xbf16>
    %9 = vector.extract_strided_slice %8 {offsets = [0, 0, 0], sizes = [9, 16, 12], strides = [1, 1, 1]} : vector<10x16x12xbf16> to vector<9x16x12xbf16>
    %10 = vector.extract_strided_slice %8 {offsets = [1, 0, 0], sizes = [9, 16, 12], strides = [1, 1, 1]} : vector<10x16x12xbf16> to vector<9x16x12xbf16>
    %11 = tpu.concatenate %9, %10 in 2 : vector<9x16x12xbf16>, vector<9x16x12xbf16> -> vector<9x16x24xbf16>
    %c0_7 = arith.constant 0 : index
    %c0_8 = arith.constant 0 : index
    %12 = vector.load %arg5[%c0_7, %c0_8] : memref<1x16xf32, #tpu.memory_space<vmem>>, vector<1x16xf32>
    %13 = vector.extract_strided_slice %11 {offsets = [0, 0, 0], sizes = [8, 16, 24], strides = [1, 1, 1]} : vector<9x16x24xbf16> to vector<8x16x24xbf16>
    %14 = vector.shape_cast %13 : vector<8x16x24xbf16> to vector<128x24xbf16>
    %c0_9 = arith.constant 0 : index
    %c0_10 = arith.constant 0 : index
    %c0_11 = arith.constant 0 : index
    %15 = vector.load %arg4[%c0_9, %c0_10, %c0_11] : memref<2x24x16xbf16, #tpu.memory_space<vmem>>, vector<1x24x16xbf16>
    %16 = vector.shape_cast %15 : vector<1x24x16xbf16> to vector<24x16xbf16>
    %cst = arith.constant dense<0.000000e+00> : vector<128x16xf32>
    %17 = tpu.matmul %14, %16, %cst {dimension_numbers = #tpu.dot_dimension_numbers<[1], [0], [0], [1], [0, 0, 1, 1], [], []>} : vector<128x24xbf16>, vector<24x16xbf16>, vector<128x16xf32> -> vector<128x16xf32>
    %18 = vector.broadcast %12 : vector<1x16xf32> to vector<128x16xf32>
    %19 = arith.addf %17, %18 : vector<128x16xf32>
    %cst_12 = arith.constant 0.000000e+00 : f32
    %20 = vector.broadcast %cst_12 : f32 to vector<128x16xf32>
    %21 = arith.maximumf %19, %20 : vector<128x16xf32>
    %22 = vector.shape_cast %21 : vector<128x16xf32> to vector<8x16x16xf32>
    %c0_13 = arith.constant 0 : index
    %c0_14 = arith.constant 0 : index
    %c0_15 = arith.constant 0 : index
    %c0_16 = arith.constant 0 : index
    %23 = vector.load %arg6[%c0_13, %c0_14, %c0_15, %c0_16] : memref<8x2x16x16xf32, #tpu.memory_space<vmem>>, vector<8x1x16x16xf32>
    %24 = vector.shape_cast %23 : vector<8x1x16x16xf32> to vector<8x16x16xf32>
    %25 = vector.shape_cast %22 : vector<8x16x16xf32> to vector<8x1x16x16xf32>
    tpu.vector_store %arg6[%c0_13, %c0_14, %c0_15, %c0_16], %25 {strides = array<i32>} : memref<8x2x16x16xf32, #tpu.memory_space<vmem>>, vector<8x1x16x16xf32>,
    %26 = vector.extract_strided_slice %11 {offsets = [1, 0, 0], sizes = [8, 16, 24], strides = [1, 1, 1]} : vector<9x16x24xbf16> to vector<8x16x24xbf16>
    %27 = vector.shape_cast %26 : vector<8x16x24xbf16> to vector<128x24xbf16>
    %c1 = arith.constant 1 : index
    %c0_17 = arith.constant 0 : index
    %c0_18 = arith.constant 0 : index
    %28 = vector.load %arg4[%c1, %c0_17, %c0_18] : memref<2x24x16xbf16, #tpu.memory_space<vmem>>, vector<1x24x16xbf16>
    %29 = vector.shape_cast %28 : vector<1x24x16xbf16> to vector<24x16xbf16>
    %cst_19 = arith.constant dense<0.000000e+00> : vector<128x16xf32>
    %30 = tpu.matmul %27, %29, %cst_19 {dimension_numbers = #tpu.dot_dimension_numbers<[1], [0], [0], [1], [0, 0, 1, 1], [], []>} : vector<128x24xbf16>, vector<24x16xbf16>, vector<128x16xf32> -> vector<128x16xf32>
    %31 = vector.broadcast %12 : vector<1x16xf32> to vector<128x16xf32>
    %32 = arith.addf %30, %31 : vector<128x16xf32>
    %cst_20 = arith.constant 0.000000e+00 : f32
    %33 = vector.broadcast %cst_20 : f32 to vector<128x16xf32>
    %34 = arith.maximumf %32, %33 : vector<128x16xf32>
    %35 = vector.shape_cast %34 : vector<128x16xf32> to vector<8x16x16xf32>
    %c0_21 = arith.constant 0 : index
    %c1_22 = arith.constant 1 : index
    %c0_23 = arith.constant 0 : index
    %c0_24 = arith.constant 0 : index
    %36 = vector.load %arg6[%c0_21, %c1_22, %c0_23, %c0_24] : memref<8x2x16x16xf32, #tpu.memory_space<vmem>>, vector<8x1x16x16xf32>
    %37 = vector.shape_cast %36 : vector<8x1x16x16xf32> to vector<8x16x16xf32>
    %38 = vector.shape_cast %35 : vector<8x16x16xf32> to vector<8x1x16x16xf32>
    tpu.vector_store %arg6[%c0_21, %c1_22, %c0_23, %c0_24], %38 {strides = array<i32>} : memref<8x2x16x16xf32, #tpu.memory_space<vmem>>, vector<8x1x16x16xf32>,
    return
  }
  func.func @transform_0(%arg0: i32, %arg1: i32) -> (i32, i32, i32, i32) {
    %c0_i32 = arith.constant 0 : i32
    %c0_i32_0 = arith.constant 0 : i32
    %c0_i32_1 = arith.constant 0 : i32
    return %arg0, %arg1, %c0_i32, %c0_i32_0 : i32, i32, i32, i32
  }
  func.func @transform_1(%arg0: i32, %arg1: i32) -> (i32, i32, i32, i32) {
    %c1_i32 = arith.constant 1 : i32
    %0 = arith.addi %arg1, %c1_i32 : i32
    %c4_i32 = arith.constant 4 : i32
    %1 = arith.muli %0, %c4_i32 : i32
    %c0_i32 = arith.constant 0 : i32
    %c0_i32_0 = arith.constant 0 : i32
    %c0_i32_1 = arith.constant 0 : i32
    return %arg0, %1, %c0_i32, %c0_i32_0 : i32, i32, i32, i32
  }
  func.func @transform_2(%arg0: i32, %arg1: i32) -> (i32, i32, i32) {
    %c0_i32 = arith.constant 0 : i32
    %c0_i32_0 = arith.constant 0 : i32
    %c0_i32_1 = arith.constant 0 : i32
    %c0_i32_2 = arith.constant 0 : i32
    return %c0_i32, %c0_i32_0, %c0_i32_1 : i32, i32, i32
  }
  func.func @transform_3(%arg0: i32, %arg1: i32) -> (i32, i32) {
    %c0_i32 = arith.constant 0 : i32
    %c0_i32_0 = arith.constant 0 : i32
    %c0_i32_1 = arith.constant 0 : i32
    return %c0_i32, %c0_i32_0 : i32, i32
  }
  func.func @transform_4(%arg0: i32, %arg1: i32) -> (i32, i32, i32, i32) {
    %c2_i32 = arith.constant 2 : i32
    %0 = arith.muli %arg0, %c2_i32 : i32
    %1 = arith.addi %0, %arg1 : i32
    %c0_i32 = arith.constant 0 : i32
    %c0_i32_0 = arith.constant 0 : i32
    %c0_i32_1 = arith.constant 0 : i32
    %c0_i32_2 = arith.constant 0 : i32
    return %1, %c0_i32, %c0_i32_0, %c0_i32_1 : i32, i32, i32, i32
  }
}

</mosaic_0001>

<bundles_post_ra>
// kernel: tpu_custom_call.1
= control target key start
LH: loop header
LB: loop body
LE: loop exit
PB: predicated region body
PF: predicated region fallthrough
CT: control target
= control target key end

     0   :  { %s1425_s15 = smov 0   ;;  %s1427_s16 = smov 0   ;;  %s1800_s0 = inlined_call_operand.vmem [shape: bf16[2,18,18,4], index: 0, kind: input, shape index: {}]   ;;  %s1801_s1 = inlined_call_operand.vmem [shape: bf16[2,18,18,4], index: 1, kind: input, shape index: {}]   ;;  %s1802_s2 = inlined_call_operand.vmem [shape: bf16[2,24,16], index: 2, kind: input, shape index: {}]   ;;  %s1803_s3 = inlined_call_operand.vmem [shape: f32[1,16], index: 3, kind: input, shape index: {}]   ;;  %s1804_s4 = inlined_call_operand.vmem [shape: f32[32,2,16,16], index: 4, kind: output, shape index: {}]  }
   0x1   :  { %s1429_s17 = smov 0   ;;  %s1431_s18 = smov 0  }
   0x2   :  { %s1433_s19 = smov 0  }
   0x3 LB: > { %s23_s20 = sadd.s32 1, %s1387_s17  ;;  %s26_s21 = sadd.s32 1, %s1391_s18  ;;  %s1395_s19 = sphi %s1433_s19, %s14_s19   ;;  %s1391_s18 = sphi %s1431_s18, %s1809_s18   ;;  %s1387_s17 = sphi %s1429_s17, %s1808_s17   ;;  %s1383_s16 = sphi %s1427_s16, %s1807_s16   ;;  %s1379_s15 = sphi %s1425_s15, %s1806_s15  }
   0x4   : > { %p24_p0 = scmp.ge.s32.totalorder %s23_s20, 2  ;;  %p1143_p1 = scmp.ge.s32.totalorder %s1395_s19, 1 }
   0x5   : > { %p222_p2 = scmp.lt.s32.totalorder %s1395_s19, 5 }
   0x6   : > { %s1811_s20 = smov (%p24_p0, %s23_s20), 0  ;;  %s1813_s21 = smov (!%p24_p0, %s26_s21), %s1391_s18 }
   0x7   : > { %p223_p3 = pnand %p1143_p1, %p222_p2  ;;  %p28_p4 = scmp.ge.s32.totalorder %s1813_s21, 2 }
   0x8   : > { %s1460_s22 = sshll.u32 (!%p223_p3), %s1379_s15, 3  ;;  %p279_p5 = scmp.lt.s32.totalorder (!%p223_p3), %s1383_s16, 1  ;;  %vm572_vm0 = vcmask (!%p223_p3), 1046528   ;;  %vm431_vm1 = vsmask.f32 (!%p223_p3), 7424  ;;  %vm747_vm2 = vcmask (!%p223_p3), 1043456  }
   0x9   : > { %s1815_s21 = smov (%p28_p4, %s1813_s21), 0  ;;  %226 = sbr.rel (%p223_p3) target bundleno = 518 (0x206), region = 36 }
   0xa   : > { %p281_p6 = scmp.lt.s32.totalorder (!%p223_p3), %s1460_s22, 17  ;;  %s1224_s6 = sadd.s32 (!%p223_p3), 8, %s1460_s22  ;;  %vm623_vm3 = vcmask (!%p223_p3), 31744   ;;  %vm644_vm4 = vcmask (!%p223_p3), 64512   ;;  %vm692_vm5 = vcmask (!%p223_p3), 97280   ;;  %vm730_vm6 = vcmask (!%p223_p3), 195584  }
   0xb   : > { %p1486_p7 = scmp.lt.s32.totalorder (!%p223_p3), %s1224_s6, 17  ;;  %s1397_s8 = smov (!%p223_p3), 8   ;;  %vm864_vm7 = vcmask (!%p223_p3), 130048  }
   0xc   : > { %s1398_s9 = smov (!%p223_p3), 4  }
  0x10   : > { %s1465_s23 = scalar_select %p279_p5, %s1383_s16, 1 }
  0x11   : > { %s282_s24 = scalar_select %p281_p6, %s1460_s22, 17 }
  0x12   : > { %s1288_s25 = smul.u32 54, %s1465_s23  ;;  %s1817_s6 = smov (!%p1486_p7, %s1224_s6), 17 }
  0x13   : > { %s1287_s26 = smul.u32 3, %s282_s24 }
  0x14   : > { %s1289_s10 = smul.u32 3, %s1817_s6  ;;  %s1149_s6 = sshll.u32 %s1383_s16, 1 }
  0x15   : > { %s285_s27 = sadd.s32 %s1288_s25, %s1287_s26  ;;  %s310_s7 = sadd.s32 %s1379_s15, %s1149_s6 }
  0x16   : > { %s1145_s28 = sshll.u32 %s285_s27, 2  ;;  %s303_s11 = sadd.s32 %s1289_s10, %s1288_s25 }
  0x17   : > { %s1474_s5 = scalar_lea.vmem %s1800_s0, %s1145_s28  ;;  %s1148_s12 = sshll.u32 %s303_s11, 2 }
  0x18   : > { %v1478_v0 = vld [vmem:[%s1474_s5 + $0xc] sm:$0xff]   ;;  %v1334_v1 = vld [vmem:[%s1474_s5 + $0x14] ss:$0 sps:$4 sm:$0x11]   ;;  %v1482_v2 = vld [vmem:[%s1474_s5 + $0x24] sm:$0xff]   ;;  %s305_s22 = scalar_lea.vmem %s1801_s1, %s1148_s12 }
  0x19   : > { %v576_v3 = vrot.slane %v1478_v0, 1  ;;  %v577_v4 = vrot.slane %v1334_v1, 1  ;;  %v1336_v5 = vld [vmem:[%s1474_s5 + $0x2c] ss:$0 sps:$4 sm:$0x11]   ;;  %v445_v6 = vshrl.u32 %v1478_v0, 16 }
  0x1a   : > { %v469_v7 = vshrl.u32 %v1482_v2, 16  ;;  %v471_v8 = vshll.u32 %v1482_v2, 16  ;;  %v447_v9 = vshll.u32 %v1478_v0, 16  ;;  %v452_v10 = vshll.u32 %v1334_v1, 16  ;;  %v1499_v15 = vld [vmem:[%s1474_s5 + $0x18] sm:$0xff]   ;;  %v1516_v36 = vld [vmem:[%s1474_s5 + $0x30] sm:$0xff]  }
  0x1b   : > { %v578_v11 = vsel %vm572_vm0, %v576_v3, %v577_v4  ;;  %v476_v12 = vshll.u32 %v1336_v5, 16  ;;  %v582_v13 = vrot.slane %v1482_v2, 1  ;;  %v583_v14 = vrot.slane %v1336_v5, 1  ;;  %v1503_v19 = vld [vmem:[%s1474_s5 + $0x3c] sm:$0xff]   ;;  %v1532_v49 = vld [vmem:[%s1474_s5 + $0x54] sm:$0xff]   ;;  %v1538_v52 = vld [vmem:[%s1474_s5 + $0x48] sm:$0xff]  }
  0x1c   : > { %605 = vrot.lane.b32.xlu1 %v578_v11, %s1397_s8  ;;  %v473_v16 = vrot.slane %v471_v8, 1  ;;  %v449_v17 = vrot.slane %v447_v9, 1  ;;  %v454_v18 = vrot.slane %v452_v10, 1  ;;  %v1338_v21 = vld [vmem:[%s1474_s5 + $0x20] ss:$0 sps:$4 sm:$0x11]  }
  0x1d   : > { %v478_v20 = vrot.slane %v476_v12, 1  ;;  %v457_v22 = vshrl.u32 %v1499_v15, 16  ;;  %v459_v23 = vshll.u32 %v1499_v15, 16  ;;  %v464_v27 = vshll.u32 %v1338_v21, 16  ;;  %v1559_v12 = vld [vmem:[%s305_s22 + $0xc] sm:$0xff]  }
  0x1e   : > { %v474_v24 = vor.u32 %v473_v16, %v469_v7  ;;  %v450_v25 = vor.u32 %v449_v17, %v445_v6  ;;  %v1340_v28 = vld [vmem:[%s1474_s5 + $0x44] ss:$0 sps:$4 sm:$0x11]   ;;  %v493_v31 = vshrl.u32 %v1503_v19, 16  ;;  %v495_v32 = vshll.u32 %v1503_v19, 16 }
  0x1f   : > { %v461_v26 = vrot.slane %v459_v23, 1  ;;  %v466_v34 = vrot.slane %v464_v27, 1  ;;  %v500_v35 = vshll.u32 %v1340_v28, 16  ;;  %v584_v37 = vsel %vm572_vm0, %v582_v13, %v583_v14  ;;  %v1342_v41 = vld [vmem:[%s1474_s5 + $0x38] ss:$0 sps:$4 sm:$0x11]  }
  0x20   : > { %v479_v29 = vsel %vm431_vm1, %v474_v24, %v478_v20  ;;  %v455_v30 = vsel %vm431_vm1, %v450_v25, %v454_v18  ;;  %v497_v38 = vrot.slane %v495_v32, 1  ;;  %v579_v39 = vrot.slane %v1499_v15, 1  ;;  %v1344_v51 = vld [vmem:[%s1474_s5 + $0x5c] ss:$0 sps:$4 sm:$0x11]   ;;  %v1567_v25 = vld [vmem:[%s305_s22] sm:$0xff]  }
  0x21   : > { %558 = vrot.lane.b32.xlu1 %v479_v29, %s1398_s9  ;;  %554 = vrot.lane.b32.xlu0 %v455_v30, %s1398_s9  ;;  %v462_v33 = vor.u32 %v461_v26, %v457_v22  ;;  %v580_v40 = vrot.slane %v1338_v21, 1  ;;  %v502_v43 = vrot.slane %v500_v35, 1  ;;  %v588_v44 = vrot.slane %v1503_v19, 1  ;;  %v1346_v63 = vld [vmem:[%s1474_s5 + $0x50] ss:$0 sps:$4 sm:$0x11]  }
  0x22   : > { %v498_v45 = vor.u32 %v497_v38, %v493_v31  ;;  %v481_v46 = vshrl.u32 %v1516_v36, 16  ;;  %v483_v47 = vshll.u32 %v1516_v36, 16  ;;  %v488_v48 = vshll.u32 %v1342_v41, 16  ;;  %v1348_v14 = vld [vmem:[%s305_s22 + $0x14] ss:$0 sps:$4 sm:$0x11]  }
  0x23   : > { %v467_v42 = vsel %vm431_vm1, %v462_v33, %v466_v34  ;;  %v589_v50 = vrot.slane %v1340_v28, 1  ;;  %v581_v54 = vsel %vm572_vm0, %v579_v39, %v580_v40  ;;  %v517_v57 = vshrl.u32 %v1532_v49, 16  ;;  %v1350_v26 = vld [vmem:[%s305_s22 + $0x8] ss:$0 sps:$4 sm:$0x11]  }
  0x24   : > { %v503_v53 = vsel %vm431_vm1, %v498_v45, %v502_v43  ;;  %v485_v55 = vrot.slane %v483_v47, 1  ;;  %v490_v56 = vrot.slane %v488_v48, 1  ;;  %v519_v58 = vshll.u32 %v1532_v49, 16 }
  0x25   : > { %609 = vrot.lane.b32.xlu1 %v584_v37, %s1397_s8  ;;  %556 = vrot.lane.b32.xlu0 %v467_v42, %s1398_s9  ;;  %v524_v59 = vshll.u32 %v1344_v51, 16  ;;  %v585_v60 = vrot.slane %v1516_v36, 1  ;;  %v586_v62 = vrot.slane %v1342_v41, 1  ;;  %v594_v3 = vrot.slane %v1532_v49, 1  ;;  %v1577_v37 = vld [vmem:[%s1474_s5] sm:$0xff]  }
  0x26   : > { %v486_v61 = vor.u32 %v485_v55, %v481_v46  ;;  %v521_v1 = vrot.slane %v519_v58, 1  ;;  %v505_v4 = vshrl.u32 %v1538_v52, 16  ;;  %v507_v5 = vshll.u32 %v1538_v52, 16  ;;  %v1352_v42 = vld [vmem:[%s1474_s5 + $0x8] ss:$0 sps:$4 sm:$0x11]  }
  0x27   : > { %v590_v6 = vsel %vm572_vm0, %v588_v44, %v589_v50  ;;  %v526_v8 = vrot.slane %v524_v59, 1  ;;  %v512_v9 = vshll.u32 %v1346_v63, 16  ;;  %v595_v13 = vrot.slane %v1344_v51, 1  ;;  %s1399_s5 = smov 12  }
  0x28   : > { %v491_v7 = vsel %vm431_vm1, %v486_v61, %v490_v56  ;;  %v522_v10 = vor.u32 %v521_v1, %v517_v57  ;;  %v509_v11 = vrot.slane %v507_v5, 1  ;;  %v543_v18 = vshll.u32 %v1559_v12, 16  ;;  %v1354_v1 = vld [vmem:[%s1802_s2 + $0xc] sm:$0xff]  }
  0x29   : > { %562 = vrot.lane.b32.xlu1 %v503_v53, %s1398_s9  ;;  %607 = vrot.lane.b32.xlu0 %v581_v54, %s1397_s8  ;;  %v514_v17 = vrot.slane %v512_v9, 1  ;;  %v587_v21 = vsel %vm572_vm0, %v585_v60, %v586_v62  ;;  %v541_v22 = vshrl.u32 %v1559_v12, 16  ;;  %v548_v23 = vshll.u32 %v1348_v14, 16 }
  0x2a   : > { %v510_v16 = vor.u32 %v509_v11, %v505_v4  ;;  %v527_v20 = vsel %vm431_vm1, %v522_v10, %v526_v8  ;;  %v545_v24 = vrot.slane %v543_v18, 1  ;;  %v596_v27 = vsel %vm572_vm0, %v594_v3, %v595_v13  ;;  %1265 = vmatprep.subr.bf16.mxu1 %v1354_v1  ;;  %v1355_v3 = vld [vmem:[%s1802_s2 + $0x8] ss:$0 sps:$4 sm:$0xff]   ;;  %v1356_v4 = vld [vmem:[%s1802_s2 + $0x14] ss:$0 sps:$4 sm:$0xff]  }
  0x2b   : > { %v591_v29 = vrot.slane %v1538_v52, 1  ;;  %v592_v30 = vrot.slane %v1346_v63, 1  ;;  %v531_v31 = vshll.u32 %v1567_v25, 16  ;;  %v550_v33 = vrot.slane %v548_v23, 1  ;;  %v1353_v63 = vld [vmem:[%s1802_s2] sm:$0xff]   ;;  %1266 = vmatpush3.bf16.msra.mxu1 %v1354_v1 }
  0x2c   : > { %v515_v28 = vsel %vm431_vm1, %v510_v16, %v514_v17  ;;  %v546_v32 = vor.u32 %v545_v24, %v541_v22  ;;  %v529_v34 = vshrl.u32 %v1567_v25, 16  ;;  %v536_v35 = vshll.u32 %v1350_v26, 16  ;;  %1245 = vmatprep.subr.bf16.mxu0 %v1353_v63  ;;  %1286 = vmatprep.subr.msk.bf16.mxu1 %vm747_vm2, %v1356_v4 }
  0x2d   : > { %613 = vrot.lane.b32.xlu1 %v590_v6, %s1397_s8  ;;  %560 = vrot.lane.b32.xlu0 %v491_v7, %s1398_s9  ;;  %v533_v38 = vrot.slane %v531_v31, 1  ;;  %v593_v39 = vsel %vm572_vm0, %v591_v29, %v592_v30  ;;  %v600_v40 = vrot.slane %v1559_v12, 1  ;;  %v601_v41 = vrot.slane %v1348_v14, 1 }
  0x2e   : > { %v551_v43 = vsel %vm431_vm1, %v546_v32, %v550_v33  ;;  %v538_v45 = vrot.slane %v536_v35, 1  ;;  %v435_v46 = vshll.u32 %v1577_v37, 16  ;;  %v433_v47 = vshrl.u32 %v1577_v37, 16  ;;  %1246 = vmatpush3.bf16.msra.mxu0 %v1353_v63  ;;  %v1682_v63 = vld [vmem:[%s1803_s3] ss:$0 sm:$0xff] }
  0x2f   : > { %v534_v44 = vor.u32 %v533_v38, %v529_v34  ;;  %v602_v48 = vsel %vm572_vm0, %v600_v40, %v601_v41  ;;  %v597_v50 = vrot.slane %v1567_v25, 1  ;;  %v598_v51 = vrot.slane %v1350_v26, 1  ;;  %1285 = vmatprep.subr.msk.bf16.mxu0 %vm747_vm2, %v1355_v3 }
  0x30   : > { %v440_v53 = vshll.u32 %v1352_v42, 16  ;;  %v437_v55 = vrot.slane %v435_v46, 1  ;;  %v573_v56 = vrot.slane %v1577_v37, 1  ;;  %v574_v57 = vrot.slane %v1352_v42, 1 }
  0x31   : > { %566 = vrot.lane.b32.xlu1 %v527_v20, %s1398_s9  ;;  %611 = vrot.lane.b32.xlu0 %v587_v21, %s1397_s8  ;;  %v539_v54 = vsel %vm431_vm1, %v534_v44, %v538_v45  ;;  %v599_v58 = vsel %vm572_vm0, %v597_v50, %v598_v51  ;;  %v749_v5 = vsel %vm747_vm2, %v1355_v3, 0  ;;  %v897_v7 = vsel %vm747_vm2, %v1356_v4, 0 }
  0x32   : > { %v438_v59 = vor.u32 %v437_v55, %v433_v47  ;;  %v442_v60 = vrot.slane %v440_v53, 1  ;;  %v575_v61 = vsel %vm572_vm0, %v573_v56, %v574_v57  ;;  %1248 = vmatpush3.bf16.msra.mxu0 %v749_v5  ;;  %1268 = vmatpush3.bf16.msra.mxu1 %v897_v7 }
  0x34   : > { %v443_v62 = vsel %vm431_vm1, %v438_v59, %v442_v60 }
  0x35   : > { %617 = vrot.lane.b32.xlu1 %v596_v27, %s1397_s8  ;;  %564 = vrot.lane.b32.xlu0 %v515_v28, %s1398_s9 }
  0x39   : > { %570 = vrot.lane.b32.xlu1 %v551_v43, %s1398_s9  ;;  %615 = vrot.lane.b32.xlu0 %v593_v39, %s1397_s8 }
  0x3d   : > { %621 = vrot.lane.b32.xlu1 %v602_v48, %s1397_s8  ;;  %568 = vrot.lane.b32.xlu0 %v539_v54, %s1398_s9 }
  0x41   : > { %619 = vrot.lane.b32.xlu0 %v599_v58, %s1397_s8  ;;  %603 = vrot.lane.b32.xlu1 %v575_v61, %s1397_s8  ;;  %s1150_s8 = sshll.u32 %s310_s7, 3 }
  0x42   : > { %p312_p8 = scmp.lt.s32.totalorder %s1150_s8, 31 }
  0x44   : > { %s1819_s8 = smov (!%p312_p8, %s1150_s8), 31 }
  0x45   : > { %552 = vrot.lane.b32.xlu0 %v443_v62, %s1398_s9  ;;  %s1222_s11 = sshll.u32 %s1819_s8, 5 }
  0x46   : > { %s1688_s14 = scalar_lea.vmem %s1804_s4, %s1222_s11 }
  0x8e   : > { %v606_v6 = vpop.permute.xlu1 %605 }
  0x93   : > { %v559_v8 = vpop.permute.xlu1 %558  ;;  %v555_v9 = vpop.permute.xlu0 %554 }
  0x94   : > { %v627_v10 = vsel %vm623_vm3, %v1478_v0, %v555_v9  ;;  %v631_v11 = vsel %vm623_vm3, %v1482_v2, %v559_v8 }
  0x95   : > { %v648_v13 = vsel %vm644_vm4, %v627_v10, %v606_v6 }
  0x96   : > { %674 = vrot.lane.b32.xlu0 %v648_v13, %s1399_s5 }
  0x97   : > { %v610_v14 = vpop.permute.xlu1 %609  ;;  %v557_v16 = vpop.permute.xlu0 %556 }
  0x98   : > { %v652_v17 = vsel %vm644_vm4, %v631_v11, %v610_v14  ;;  %v629_v18 = vsel %vm623_vm3, %v1499_v15, %v557_v16 }
  0x9a   : > { %678 = vrot.lane.b32.xlu0 %v652_v17, %s1399_s5 }
  0x9b   : > { %v563_v20 = vpop.permute.xlu1 %562  ;;  %v608_v21 = vpop.permute.xlu0 %607 }
  0x9c   : > { %v650_v0 = vsel %vm644_vm4, %v629_v18, %v608_v21  ;;  %v635_v2 = vsel %vm623_vm3, %v1503_v19, %v563_v20 }
  0x9d   : > { %676 = vrot.lane.b32.xlu1 %v650_v0, %s1399_s5 }
  0x9f   : > { %v614_v22 = vpop.permute.xlu1 %613  ;;  %v561_v23 = vpop.permute.xlu0 %560 }
  0xa0   : > { %v656_v24 = vsel %vm644_vm4, %v635_v2, %v614_v22  ;;  %v633_v26 = vsel %vm623_vm3, %v1516_v36, %v561_v23 }
  0xa1   : > { %682 = vrot.lane.b32.xlu0 %v656_v24, %s1399_s5 }
  0xa3   : > { %v567_v27 = vpop.permute.xlu1 %566  ;;  %v612_v15 = vpop.permute.xlu0 %611 }
  0xa4   : > { %v654_v28 = vsel %vm644_vm4, %v633_v26, %v612_v15  ;;  %v639_v29 = vsel %vm623_vm3, %v1532_v49, %v567_v27 }
  0xa5   : > { %680 = vrot.lane.b32.xlu1 %v654_v28, %s1399_s5 }
  0xa7   : > { %v618_v19 = vpop.permute.xlu1 %617  ;;  %v565_v30 = vpop.permute.xlu0 %564 }
  0xa8   : > { %v660_v31 = vsel %vm644_vm4, %v639_v29, %v618_v19  ;;  %v637_v32 = vsel %vm623_vm3, %v1538_v52, %v565_v30 }
  0xa9   : > { %686 = vrot.lane.b32.xlu0 %v660_v31, %s1399_s5 }
  0xab   : > { %v571_v33 = vpop.permute.xlu1 %570  ;;  %v616_v36 = vpop.permute.xlu0 %615 }
  0xac   : > { %v658_v34 = vsel %vm644_vm4, %v637_v32, %v616_v36  ;;  %v643_v35 = vsel %vm623_vm3, %v1559_v12, %v571_v33 }
  0xad   : > { %684 = vrot.lane.b32.xlu1 %v658_v34, %s1399_s5 }
  0xaf   : > { %v622_v49 = vpop.permute.xlu1 %621  ;;  %v569_v38 = vpop.permute.xlu0 %568 }
  0xb0   : > { %v664_v39 = vsel %vm644_vm4, %v643_v35, %v622_v49  ;;  %v641_v40 = vsel %vm623_vm3, %v1567_v25, %v569_v38 }
  0xb1   : > { %690 = vrot.lane.b32.xlu0 %v664_v39, %s1399_s5 }
  0xb3   : > { %v620_v41 = vpop.permute.xlu0 %619  ;;  %v604_v42 = vpop.permute.xlu1 %603 }
  0xb4   : > { %v662_v52 = vsel %vm644_vm4, %v641_v40, %v620_v41 }
  0xb5   : > { %688 = vrot.lane.b32.xlu1 %v662_v52, %s1399_s5 }
  0xb7   : > { %v553_v43 = vpop.permute.xlu0 %552 }
  0xb8   : > { %v625_v12 = vsel %vm623_vm3, %v1577_v37, %v553_v43 }
  0xb9   : > { %v646_v44 = vsel %vm644_vm4, %v625_v12, %v604_v42 }
 0x108   : > { %v675_v45 = vpop.permute.xlu0 %674 }
 0x109   : > { %v694_v46 = vsel %vm692_vm5, %v646_v44, %v675_v45 }
 0x10a   : > { %1249 = vmatprep.mubr.msk.bf16.mxu0 %vm730_vm6, %v694_v46 }
 0x10c   : > { %v679_v25 = vpop.permute.xlu0 %678 }
 0x10d   : > { %v698_v50 = vsel %vm692_vm5, %v650_v0, %v679_v25 }
 0x10f   : > { %v677_v47 = vpop.permute.xlu1 %676 }
 0x110   : > { %v696_v48 = vsel %vm692_vm5, %v648_v13, %v677_v47 }
 0x111   : > { %1250 = vmatmul.mubr.msk.bf16.vlgmr.msra.gmra.mrb[0].mxu0 %vm730_vm6, %v696_v48  ;;  %1269 = vmatprep.mubr.msk.bf16.mxu1 %vm730_vm6, %v696_v48 }
 0x112   : > { %1253 = vmatprep.mubr.msk.bf16.mxu0 %vm730_vm6, %v698_v50  ;;  %1270 = vmatmul.mubr.msk.bf16.vlgmr.msra.gmra.mrb[0].mxu1 %vm730_vm6, %v698_v50 }
 0x113   : > { %v683_v37 = vpop.permute.xlu0 %682 }
 0x114   : > { %v702_v54 = vsel %vm692_vm5, %v654_v28, %v683_v37 }
 0x117   : > { %v681_v51 = vpop.permute.xlu1 %680 }
 0x118   : > { %v700_v53 = vsel %vm692_vm5, %v652_v17, %v681_v51 }
 0x119   : > { %1254 = vmatmul.mubr.msk.bf16.gmra.mrb[4].mxu0 %vm730_vm6, %v700_v53  ;;  %1273 = vmatprep.mubr.msk.bf16.mxu1 %vm730_vm6, %v700_v53 }
 0x11a   : > { %1257 = vmatprep.mubr.msk.bf16.mxu0 %vm730_vm6, %v702_v54  ;;  %1274 = vmatmul.mubr.msk.bf16.gmra.mrb[4].mxu1 %vm730_vm6, %v702_v54 }
 0x11b   : > { %v687_v55 = vpop.permute.xlu0 %686 }
 0x11c   : > { %v706_v58 = vsel %vm692_vm5, %v658_v34, %v687_v55 }
 0x11f   : > { %v685_v56 = vpop.permute.xlu1 %684 }
 0x120   : > { %v704_v57 = vsel %vm692_vm5, %v656_v24, %v685_v56 }
 0x121   : > { %1258 = vmatmul.mubr.msk.bf16.gmra.mrb[8].mxu0 %vm730_vm6, %v704_v57  ;;  %1277 = vmatprep.mubr.msk.bf16.mxu1 %vm730_vm6, %v704_v57 }
 0x122   : > { %1261 = vmatprep.mubr.msk.bf16.mxu0 %vm730_vm6, %v706_v58  ;;  %1278 = vmatmul.mubr.msk.bf16.gmra.mrb[8].mxu1 %vm730_vm6, %v706_v58 }
 0x123   : > { %v691_v59 = vpop.permute.xlu0 %690 }
 0x124   : > { %v710_v62 = vsel %vm692_vm5, %v662_v52, %v691_v59 }
 0x127   : > { %v689_v60 = vpop.permute.xlu1 %688 }
 0x128   : > { %v708_v61 = vsel %vm692_vm5, %v660_v31, %v689_v60 }
 0x129   : > { %1262 = vmatmul.mubr.msk.bf16.gmra.mrb[12].mxu0 %vm730_vm6, %v708_v61  ;;  %1281 = vmatprep.mubr.msk.bf16.mxu1 %vm730_vm6, %v708_v61 }
 0x12a   : > { %1282 = vmatmul.mubr.msk.bf16.gmra.mrb[12].mxu1 %vm730_vm6, %v710_v62 }
 0x1e4   : > { %v1251_v1 = vpop.f32.mrb[0].mxu0 }
 0x1e5   : > { %v794_v3 = vadd.f32 %v1251_v1, %v1682_v63  ;;  %v785_v4 = vpop.f32.mrb[1].mxu0  ;;  %v1271_v5 = vpop.f32.mrb[0].mxu1 }
 0x1e6   : > { %v786_v6 = vadd.f32 %v1682_v63, %v785_v4  ;;  %v942_v7 = vadd.f32 %v1271_v5, %v1682_v63  ;;  %v1252_v8 = vpop.f32.mrb[2].mxu0  ;;  %v933_v9 = vpop.f32.mrb[1].mxu1 }
 0x1e7   : > { %v850_v10 = vmax.f32 %v794_v3, 0.0  ;;  %v797_v11 = vadd.f32 %v1252_v8, %v1682_v63  ;;  %v934_v13 = vadd.f32 %v1682_v63, %v933_v9  ;;  %v788_v14 = vpop.f32.mrb[3].mxu0  ;;  %v1272_v16 = vpop.f32.mrb[2].mxu1 }
 0x1e8   : > { %v848_v17 = vmax.f32 %v786_v6, 0.0  ;;  %v998_v18 = vmax.f32 %v942_v7, 0.0  ;;  %v789_v20 = vadd.f32 %v1682_v63, %v788_v14  ;;  %v945_v21 = vadd.f32 %v1272_v16, %v1682_v63  ;;  %v936_v0 = vpop.f32.mrb[3].mxu1 }
 0x1e9   : > { %867 = vst.msk [vmem:[%s1688_s14 + $0x20] sm:$0xff] %vm864_vm7, %v850_v10  ;;  %v851_v2 = vmax.f32 %v797_v11, 0.0  ;;  %v996_v22 = vmax.f32 %v934_v13, 0.0  ;;  %v937_v23 = vadd.f32 %v1682_v63, %v936_v0 }
 0x1ea   : > { %865 = vst.msk [vmem:[%s1688_s14] sm:$0xff] %vm864_vm7, %v848_v17  ;;  %1199 = vst.msk [vmem:[%s1688_s14 + $0x30] sm:$0xff] %vm864_vm7, %v998_v18  ;;  %v849_v24 = vmax.f32 %v789_v20, 0.0  ;;  %v999_v26 = vmax.f32 %v945_v21, 0.0 }
 0x1eb   : > { %868 = vst.msk [vmem:[%s1688_s14 + $0x28] sm:$0xff] %vm864_vm7, %v851_v2  ;;  %1197 = vst.msk [vmem:[%s1688_s14 + $0x10] sm:$0xff] %vm864_vm7, %v996_v22  ;;  %v997_v27 = vmax.f32 %v937_v23, 0.0 }
 0x1ec   : > { %866 = vst.msk [vmem:[%s1688_s14 + $0x8] sm:$0xff] %vm864_vm7, %v849_v24  ;;  %1200 = vst.msk [vmem:[%s1688_s14 + $0x38] sm:$0xff] %vm864_vm7, %v999_v26  ;;  %v1255_v15 = vpop.f32.mrb[4].mxu0 }
 0x1ed   : > { %1198 = vst.msk [vmem:[%s1688_s14 + $0x18] sm:$0xff] %vm864_vm7, %v997_v27  ;;  %v810_v28 = vadd.f32 %v1255_v15, %v1682_v63  ;;  %v801_v29 = vpop.f32.mrb[5].mxu0  ;;  %v1275_v19 = vpop.f32.mrb[4].mxu1 }
 0x1ee   : > { %v802_v30 = vadd.f32 %v1682_v63, %v801_v29  ;;  %v958_v31 = vadd.f32 %v1275_v19, %v1682_v63  ;;  %v1256_v32 = vpop.f32.mrb[6].mxu0  ;;  %v949_v33 = vpop.f32.mrb[5].mxu1 }
 0x1ef   : > { %v854_v36 = vmax.f32 %v810_v28, 0.0  ;;  %v813_v34 = vadd.f32 %v1256_v32, %v1682_v63  ;;  %v950_v35 = vadd.f32 %v1682_v63, %v949_v33  ;;  %v804_v49 = vpop.f32.mrb[7].mxu0  ;;  %v1276_v38 = vpop.f32.mrb[6].mxu1 }
 0x1f0   : > { %v852_v39 = vmax.f32 %v802_v30, 0.0  ;;  %v1002_v40 = vmax.f32 %v958_v31, 0.0  ;;  %v805_v41 = vadd.f32 %v1682_v63, %v804_v49  ;;  %v961_v52 = vadd.f32 %v1276_v38, %v1682_v63  ;;  %v952_v42 = vpop.f32.mrb[7].mxu1 }
 0x1f1   : > { %871 = vst.msk [vmem:[%s1688_s14 + $0x60] sm:$0xff] %vm864_vm7, %v854_v36  ;;  %v855_v43 = vmax.f32 %v813_v34, 0.0  ;;  %v1000_v12 = vmax.f32 %v950_v35, 0.0  ;;  %v953_v44 = vadd.f32 %v1682_v63, %v952_v42 }
 0x1f2   : > { %869 = vst.msk [vmem:[%s1688_s14 + $0x40] sm:$0xff] %vm864_vm7, %v852_v39  ;;  %1203 = vst.msk [vmem:[%s1688_s14 + $0x70] sm:$0xff] %vm864_vm7, %v1002_v40  ;;  %v853_v45 = vmax.f32 %v805_v41, 0.0  ;;  %v1003_v46 = vmax.f32 %v961_v52, 0.0 }
 0x1f3   : > { %872 = vst.msk [vmem:[%s1688_s14 + $0x68] sm:$0xff] %vm864_vm7, %v855_v43  ;;  %1201 = vst.msk [vmem:[%s1688_s14 + $0x50] sm:$0xff] %vm864_vm7, %v1000_v12  ;;  %v1001_v25 = vmax.f32 %v953_v44, 0.0 }
 0x1f4   : > { %870 = vst.msk [vmem:[%s1688_s14 + $0x48] sm:$0xff] %vm864_vm7, %v853_v45  ;;  %1204 = vst.msk [vmem:[%s1688_s14 + $0x78] sm:$0xff] %vm864_vm7, %v1003_v46  ;;  %v1259_v47 = vpop.f32.mrb[8].mxu0 }
 0x1f5   : > { %1202 = vst.msk [vmem:[%s1688_s14 + $0x58] sm:$0xff] %vm864_vm7, %v1001_v25  ;;  %v826_v48 = vadd.f32 %v1259_v47, %v1682_v63  ;;  %v817_v50 = vpop.f32.mrb[9].mxu0  ;;  %v1279_v37 = vpop.f32.mrb[8].mxu1 }
 0x1f6   : > { %v818_v51 = vadd.f32 %v1682_v63, %v817_v50  ;;  %v974_v53 = vadd.f32 %v1279_v37, %v1682_v63  ;;  %v1260_v54 = vpop.f32.mrb[10].mxu0  ;;  %v965_v55 = vpop.f32.mrb[9].mxu1 }
 0x1f7   : > { %v858_v56 = vmax.f32 %v826_v48, 0.0  ;;  %v829_v57 = vadd.f32 %v1260_v54, %v1682_v63  ;;  %v966_v58 = vadd.f32 %v1682_v63, %v965_v55  ;;  %v820_v59 = vpop.f32.mrb[11].mxu0  ;;  %v1280_v60 = vpop.f32.mrb[10].mxu1 }
 0x1f8   : > { %v856_v61 = vmax.f32 %v818_v51, 0.0  ;;  %v1006_v62 = vmax.f32 %v974_v53, 0.0  ;;  %v821_v1 = vadd.f32 %v1682_v63, %v820_v59  ;;  %v977_v3 = vadd.f32 %v1280_v60, %v1682_v63  ;;  %v968_v4 = vpop.f32.mrb[11].mxu1 }
 0x1f9   : > { %875 = vst.msk [vmem:[%s1688_s14 + $0xa0] sm:$0xff] %vm864_vm7, %v858_v56  ;;  %v859_v5 = vmax.f32 %v829_v57, 0.0  ;;  %v1004_v6 = vmax.f32 %v966_v58, 0.0  ;;  %v969_v7 = vadd.f32 %v1682_v63, %v968_v4 }
 0x1fa   : > { %873 = vst.msk [vmem:[%s1688_s14 + $0x80] sm:$0xff] %vm864_vm7, %v856_v61  ;;  %1207 = vst.msk [vmem:[%s1688_s14 + $0xb0] sm:$0xff] %vm864_vm7, %v1006_v62  ;;  %v857_v8 = vmax.f32 %v821_v1, 0.0  ;;  %v1007_v9 = vmax.f32 %v977_v3, 0.0 }
 0x1fb   : > { %876 = vst.msk [vmem:[%s1688_s14 + $0xa8] sm:$0xff] %vm864_vm7, %v859_v5  ;;  %1205 = vst.msk [vmem:[%s1688_s14 + $0x90] sm:$0xff] %vm864_vm7, %v1004_v6  ;;  %v1005_v10 = vmax.f32 %v969_v7, 0.0 }
 0x1fc   : > { %874 = vst.msk [vmem:[%s1688_s14 + $0x88] sm:$0xff] %vm864_vm7, %v857_v8  ;;  %1208 = vst.msk [vmem:[%s1688_s14 + $0xb8] sm:$0xff] %vm864_vm7, %v1007_v9  ;;  %v1263_v11 = vpop.f32.mrb[12].mxu0 }
 0x1fd   : > { %1206 = vst.msk [vmem:[%s1688_s14 + $0x98] sm:$0xff] %vm864_vm7, %v1005_v10  ;;  %v842_v13 = vadd.f32 %v1263_v11, %v1682_v63  ;;  %v833_v14 = vpop.f32.mrb[13].mxu0  ;;  %v1283_v16 = vpop.f32.mrb[12].mxu1 }
 0x1fe   : > { %v834_v17 = vadd.f32 %v1682_v63, %v833_v14  ;;  %v990_v18 = vadd.f32 %v1283_v16, %v1682_v63  ;;  %v1264_v20 = vpop.f32.mrb[14].mxu0  ;;  %v981_v21 = vpop.f32.mrb[13].mxu1 }
 0x1ff   : > { %v862_v0 = vmax.f32 %v842_v13, 0.0  ;;  %v845_v2 = vadd.f32 %v1264_v20, %v1682_v63  ;;  %v982_v22 = vadd.f32 %v1682_v63, %v981_v21  ;;  %v836_v23 = vpop.f32.mrb[15].mxu0  ;;  %v1284_v24 = vpop.f32.mrb[14].mxu1 }
 0x200   : > { %v860_v26 = vmax.f32 %v834_v17, 0.0  ;;  %v1010_v27 = vmax.f32 %v990_v18, 0.0  ;;  %v837_v15 = vadd.f32 %v1682_v63, %v836_v23  ;;  %v993_v28 = vadd.f32 %v1284_v24, %v1682_v63  ;;  %v984_v29 = vpop.f32.mrb[15].mxu1 }
 0x201   : > { %879 = vst.msk [vmem:[%s1688_s14 + $0xe0] sm:$0xff] %vm864_vm7, %v862_v0  ;;  %v863_v19 = vmax.f32 %v845_v2, 0.0  ;;  %v1008_v30 = vmax.f32 %v982_v22, 0.0  ;;  %v985_v31 = vadd.f32 %v1682_v63, %v984_v29 }
 0x202   : > { %877 = vst.msk [vmem:[%s1688_s14 + $0xc0] sm:$0xff] %vm864_vm7, %v860_v26  ;;  %1211 = vst.msk [vmem:[%s1688_s14 + $0xf0] sm:$0xff] %vm864_vm7, %v1010_v27  ;;  %v861_v32 = vmax.f32 %v837_v15, 0.0  ;;  %v1011_v33 = vmax.f32 %v993_v28, 0.0 }
 0x203   : > { %880 = vst.msk [vmem:[%s1688_s14 + $0xe8] sm:$0xff] %vm864_vm7, %v863_v19  ;;  %1209 = vst.msk [vmem:[%s1688_s14 + $0xd0] sm:$0xff] %vm864_vm7, %v1008_v30  ;;  %v1009_v36 = vmax.f32 %v985_v31, 0.0 }
 0x204   : > { %878 = vst.msk [vmem:[%s1688_s14 + $0xc8] sm:$0xff] %vm864_vm7, %v861_v32  ;;  %1212 = vst.msk [vmem:[%s1688_s14 + $0xf8] sm:$0xff] %vm864_vm7, %v1011_v33 }
 0x205   : > { %1210 = vst.msk [vmem:[%s1688_s14 + $0xd8] sm:$0xff] %vm864_vm7, %v1009_v36 }
 0x206 PF: > { %s14_s19 = sadd.s32 1, %s1395_s19   ;;  %s1806_s15 = smov %s1387_s17 }
 0x207   : > { %p11_p9 = scmp.ge.s32.totalorder %s14_s19, 6   ;;  %s1807_s16 = smov %s1391_s18 }
 0x208   : > { %s1808_s17 = smov %s1811_s20  ;;  %s1809_s18 = smov %s1815_s21 }
 0x209   :  { %13 = sbr.rel (!%p11_p9) target bundleno = 3 (0x3), region = 71 }

</bundles_post_ra>
